<compile_context>
chip_gen: v7x
topology: tpu7x:2x2x1
jax: 0.10.0
libtpu: 0.0.40
codegen_flags: <defaults>
</compile_context>

<pallas_src>
import functools

import jax
import jax.numpy as jnp
from jax import lax
from jax.experimental import pallas as pl
from jax.experimental.pallas import tpu as pltpu


def _round_up(x, m):
    return ((x + m - 1) // m) * m


def _default_num_cores():
    """2 TensorCores per chip only on v7x; v2-v6 present one core per device."""
    try:
        kind = jax.devices()[0].device_kind.lower()
    except Exception:
        return 1
    return 2 if ("v7" in kind or "tpu7" in kind) else 1


def _vmem_budget_bytes():
    """~75% of the detected per-core VMEM (64 MiB v7x, 128 MiB v5e/v6e)."""
    cap = 64 * 1024 * 1024  # conservative fallback = smallest (v7x) size
    try:
        cap = int(pltpu.get_tpu_info().vmem_capacity_bytes)
    except Exception:
        pass
    return (cap * 3) // 4


def _loss_kernel(u_ref, h_ref, out_ref, *, window_length, n_valid,
                 block_nodes, steps_per_core):
    # u_ref: (D, P, bn), h_ref: (D, bn), out_ref: (1, P, bn) resident accumulator.
    c = pl.program_id(0)          # core axis ("parallel")
    i = pl.program_id(1)          # node-tile axis ("arbitrary", accumulates)

    @pl.when(i == 0)
    def _():
        out_ref[...] = jnp.zeros_like(out_ref)

    # Compute in f32 regardless of the (possibly bf16) storage dtype.
    u = u_ref[...].astype(jnp.float32)            # (D, P, bn)
    h = h_ref[...].astype(jnp.float32)            # (D, bn)

    # scores[p, n] = <u[:, p, n], h[:, n]>; D leading => pure VPU mul/add
    # chain over lane-dense (P, bn) vregs, no cross-lane reduce.
    scores = jnp.sum(u * h[:, None, :], axis=0)   # (P, bn)

    # Softmax over the path dimension (sublanes), kept in log space.
    m = jnp.max(scores, axis=0, keepdims=True)    # (1, bn)
    z = scores - m
    e = jnp.exp(z)
    denom = jnp.sum(e, axis=0, keepdims=True)     # (1, bn)
    log_denom = jnp.log(denom)

    # cols <  W : log(p)     = z - log(denom)
    # cols >= W : log(1 - p) = log(denom - e) - log(denom)
    path_idx = lax.broadcasted_iota(jnp.int32, scores.shape, 0)      # (P, bn)
    terms = jnp.where(path_idx < window_length, z, jnp.log(denom - e)) - log_denom

    tile_start = (c * steps_per_core + i) * block_nodes
    needs_mask = tile_start + block_nodes > n_valid   # only tiles with padding

    @pl.when(jnp.logical_not(needs_mask))
    def _():
        out_ref[...] += terms[None]

    @pl.when(needs_mask)
    def _():
        node_idx = tile_start + lax.broadcasted_iota(jnp.int32, terms.shape, 1)
        out_ref[...] += jnp.where(node_idx < n_valid, terms, 0.0)[None]


def embedding_model_loss(x, emb_h, emb_u, window_length, *,
                         block_nodes=None, num_cores=None,
                         gather_dtype=jnp.bfloat16, u_buffer_count=2):
    """x: int32 (N, L); emb_h/emb_u: (V, D). Returns the scalar path loss."""
    N, L = x.shape
    P = L - 1
    D = emb_h.shape[1]

    if num_cores is None:
        num_cores = _default_num_cores()
    num_cores = max(1, int(num_cores))

    store_dtype = (jnp.dtype(gather_dtype) if gather_dtype is not None
                   else jnp.dtype(emb_h.dtype))
    in_bytes = store_dtype.itemsize
    vmem_budget = _vmem_budget_bytes()

    # Node tile: multiple of 128 (lane width), sized against the VMEM budget.
    if block_nodes is None:
        block_nodes = 2048
    bn = min(int(block_nodes), _round_up(pl.cdiv(N, num_cores), 128))
    bn = _round_up(max(bn, 128), 128)
    while bn > 128:
        need = (max(2, int(u_buffer_count)) * D * P * bn * in_bytes   # u stream
                + 2 * D * bn * in_bytes                               # h stream
                + _round_up(P, 8) * bn * 4                            # resident out
                + (4 << 20))                                          # slack
        if need <= vmem_budget:
            break
        bn -= 128
    steps = pl.cdiv(N, num_cores * bn)
    n_pad = num_cores * steps * bn

    # Embedding gathers stay in XLA (glue), but:
    #  * tables are cast to the gather dtype (default bf16) BEFORE the take so
    #    the big gathered tensors land in HBM at half width, and
    #  * the small tables are transposed first so the gathered tensors come
    #    out D-leading -- (D, P, N) / (D, N) -- without an extra pass over the
    #    large gathered tensor.
    emb_h_t = emb_h.astype(store_dtype).T                    # (D, V)
    emb_u_t = emb_u.astype(store_dtype).T                    # (D, V)
    h = jnp.take(emb_h_t, x[:, 0], axis=1)                   # (D, N)
    u = jnp.take(emb_u_t, x[:, 1:].T, axis=1)                # (D, P, N)
    h = jnp.pad(h, ((0, 0), (0, n_pad - N)))
    u = jnp.pad(u, ((0, 0), (0, 0), (0, n_pad - N)))

    kernel = functools.partial(
        _loss_kernel,
        window_length=int(window_length),
        n_valid=int(N),
        block_nodes=int(bn),
        steps_per_core=int(steps),
    )

    u_map = lambda c, i: (0, 0, c * steps + i)
    h_map = lambda c, i: (0, c * steps + i)
    if int(u_buffer_count) > 2:
        # Perf knob (review): deepen the u pipeline only if profiling shows
        # exposed DMA at step boundaries.
        u_spec = pl.BlockSpec((D, P, bn), u_map,
                              pipeline_mode=pl.Buffered(int(u_buffer_count)))
    else:
        u_spec = pl.BlockSpec((D, P, bn), u_map)

    out = pl.pallas_call(
        kernel,
        out_shape=jax.ShapeDtypeStruct((num_cores, P, bn), jnp.float32),
        grid_spec=pltpu.PrefetchScalarGridSpec(
            num_scalar_prefetch=0,
            grid=(num_cores, steps),
            in_specs=[u_spec, pl.BlockSpec((D, bn), h_map)],
            out_specs=pl.BlockSpec((1, P, bn), lambda c, i: (c, 0, 0)),
        ),
        compiler_params=pltpu.CompilerParams(
            dimension_semantics=("parallel", "arbitrary"),
            vmem_limit_bytes=int(vmem_budget),
        ),
    )(u, h)

    return -jnp.sum(out)


def _reference_loss(x, emb_h, emb_u, window_length):
    """Pure-JAX reference mirroring the PyTorch forward."""
    label_nodes = x[:, 0]
    data_nodes = x[:, 1:]
    u = jnp.take(emb_u, data_nodes, axis=0)                  # (N, P, D)
    h = jnp.take(emb_h, label_nodes, axis=0)                 # (N, D)
    scores = jnp.sum(u * h[:, None, :], axis=-1)             # (N, P)
    p = jax.nn.softmax(scores, axis=1)
    q = jnp.concatenate([p[:, :window_length], 1.0 - p[:, window_length:]], axis=1)
    return -jnp.sum(jnp.log(q))


if __name__ == "__main__":
    # Small shapes consistent with the module's forward.
    dict_length = 1000      # len(net_dict)
    embedding_dim = 50      # default embedding_dimension
    num_nodes = 200         # deliberately NOT a multiple of the node tile
    path_length = 9         # x: (num_nodes, path_length); P = 8
    window_length = 3

    key = jax.random.PRNGKey(0)
    k_h, k_u, k_x = jax.random.split(key, 3)

    # Scaled-down init keeps the softmax away from saturation so the f32
    # kernel/reference comparison is well conditioned.
    emb_h = 0.1 * jax.random.normal(k_h, (dict_length, embedding_dim), jnp.float32)
    emb_u = 0.1 * jax.random.normal(k_u, (dict_length, embedding_dim), jnp.float32)
    x = jax.random.randint(
        k_x, (num_nodes, path_length), 0, dict_length, dtype=jnp.int32
    )

    ref = jax.block_until_ready(_reference_loss(x, emb_h, emb_u, window_length))

    # f32 gather path: tight check against the f32 reference.
    loss_f32 = jax.block_until_ready(
        embedding_model_loss(x, emb_h, emb_u, window_length,
                             gather_dtype=jnp.float32))
    assert jnp.allclose(loss_f32, ref, rtol=3e-5, atol=1e-2), (loss_f32, ref)

    # Small tile, single core: multi-step accumulation + padded tail rows.
    loss_steps = jax.block_until_ready(
        embedding_model_loss(x, emb_h, emb_u, window_length,
                             gather_dtype=jnp.float32,
                             block_nodes=128, num_cores=1))
    assert jnp.allclose(loss_steps, ref, rtol=3e-5, atol=1e-2), (loss_steps, ref)

    # Forced 2-core grid: exercises the "parallel" core axis + a core whose
    # tile is partially padding (masked in-kernel).
    loss_cores = jax.block_until_ready(
        embedding_model_loss(x, emb_h, emb_u, window_length,
                             gather_dtype=jnp.float32,
                             block_nodes=128, num_cores=2))
    assert jnp.allclose(loss_cores, ref, rtol=3e-5, atol=1e-2), (loss_cores, ref)

    # Default (bf16 gather) path: halves the dominant HBM stream; looser
    # tolerance since the gathered values are quantized to bf16.
    loss_bf16 = jax.block_until_ready(
        embedding_model_loss(x, emb_h, emb_u, window_length))
    assert jnp.allclose(loss_bf16, ref, rtol=1e-2, atol=1.0), (loss_bf16, ref)

    print("KERNEL_OK")
</pallas_src>

<mosaic_0001>
module attributes {stable_mosaic.version = 11 : i64} {
  func.func @_loss_kernel(%arg0: i32, %arg1: i32, %arg2: memref<50x8x256xf32, #tpu.memory_space<vmem>>, %arg3: memref<50x256xf32, #tpu.memory_space<vmem>>, %arg4: memref<1x8x256xf32, #tpu.memory_space<vmem>>) attributes {dimension_semantics = [#tpu.dimension_semantics<parallel>, #tpu.dimension_semantics<arbitrary>], iteration_bounds = array<i64: 1, 1>, scalar_prefetch = 0 : i64, scratch_operands = 0 : i64, tpu.core_type = #tpu.core_type<tc>, window_params = [{transform_indices = @transform_0, window_bounds = array<i64: 50, 8, 256>}, {transform_indices = @transform_1, window_bounds = array<i64: 50, 256>}, {transform_indices = @transform_2, window_bounds = array<i64: 1, 8, 256>}]} {
    %c0_i32 = arith.constant 0 : i32
    %0 = arith.cmpi eq, %arg1, %c0_i32 : i32
    %1 = arith.extui %0 : i1 to i32
    %c0_i32_0 = arith.constant 0 : i32
    %2 = arith.cmpi ne, %1, %c0_i32_0 : i32
    scf.if %2 {
      %cst_10 = arith.constant 0.000000e+00 : f32
      %36 = vector.broadcast %cst_10 : f32 to vector<1x8x256xf32>
      %c0_11 = arith.constant 0 : index
      %c0_12 = arith.constant 0 : index
      %c0_13 = arith.constant 0 : index
      %37 = vector.load %arg4[%c0_11, %c0_12, %c0_13] : memref<1x8x256xf32, #tpu.memory_space<vmem>>, vector<1x8x256xf32>
      tpu.vector_store %arg4[%c0_11, %c0_12, %c0_13], %36 {strides = array<i32>} : memref<1x8x256xf32, #tpu.memory_space<vmem>>, vector<1x8x256xf32>,
    } else {
    }
    %c0 = arith.constant 0 : index
    %c0_1 = arith.constant 0 : index
    %c0_2 = arith.constant 0 : index
    %3 = vector.load %arg2[%c0, %c0_1, %c0_2] : memref<50x8x256xf32, #tpu.memory_space<vmem>>, vector<50x8x256xf32>
    %c0_3 = arith.constant 0 : index
    %c0_4 = arith.constant 0 : index
    %4 = vector.load %arg3[%c0_3, %c0_4] : memref<50x256xf32, #tpu.memory_space<vmem>>, vector<50x256xf32>
    %5 = vector.shape_cast %4 : vector<50x256xf32> to vector<50x1x256xf32>
    %6 = vector.broadcast %5 : vector<50x1x256xf32> to vector<50x8x256xf32>
    %7 = arith.mulf %3, %6 : vector<50x8x256xf32>
    %cst = arith.constant dense<0.000000e+00> : vector<8x256xf32>
    %8 = vector.multi_reduction <add>, %7, %cst [0] : vector<50x8x256xf32> to vector<8x256xf32>
    %cst_5 = arith.constant dense<0xFF800000> : vector<256xf32>
    %9 = vector.multi_reduction <maximumf>, %8, %cst_5 [0] : vector<8x256xf32> to vector<256xf32>
    %10 = vector.shape_cast %9 : vector<256xf32> to vector<1x256xf32>
    %11 = vector.broadcast %10 : vector<1x256xf32> to vector<8x256xf32>
    %12 = arith.subf %8, %11 : vector<8x256xf32>
    %13 = math.exp %12 : vector<8x256xf32>
    %cst_6 = arith.constant dense<0.000000e+00> : vector<256xf32>
    %14 = vector.multi_reduction <add>, %13, %cst_6 [0] : vector<8x256xf32> to vector<256xf32>
    %15 = vector.shape_cast %14 : vector<256xf32> to vector<1x256xf32>
    %16 = math.log %15 : vector<1x256xf32>
    %17 = tpu.iota {dimensions = array<i32: 0>} : vector<8x256xi32>
    %c3_i32 = arith.constant 3 : i32
    %18 = vector.broadcast %c3_i32 : i32 to vector<8x256xi32>
    %19 = arith.cmpi slt, %17, %18 : vector<8x256xi32>
    %20 = vector.broadcast %15 : vector<1x256xf32> to vector<8x256xf32>
    %21 = arith.subf %20, %13 : vector<8x256xf32>
    %22 = math.log %21 : vector<8x256xf32>
    %23 = arith.select %19, %12, %22 : vector<8x256xi1>, vector<8x256xf32>
    %24 = vector.broadcast %16 : vector<1x256xf32> to vector<8x256xf32>
    %25 = arith.subf %23, %24 : vector<8x256xf32>
    %c1_i32 = arith.constant 1 : i32
    %26 = arith.muli %arg0, %c1_i32 : i32
    %27 = arith.addi %26, %arg1 : i32
    %c256_i32 = arith.constant 256 : i32
    %28 = arith.muli %27, %c256_i32 : i32
    %c256_i32_7 = arith.constant 256 : i32
    %29 = arith.addi %28, %c256_i32_7 : i32
    %c200_i32 = arith.constant 200 : i32
    %30 = arith.cmpi sgt, %29, %c200_i32 : i32
    %true = arith.constant true
    %31 = arith.xori %30, %true : i1
    %32 = arith.extui %31 : i1 to i32
    %c0_i32_8 = arith.constant 0 : i32
    %33 = arith.cmpi ne, %32, %c0_i32_8 : i32
    scf.if %33 {
      %c0_10 = arith.constant 0 : index
      %c0_11 = arith.constant 0 : index
      %c0_12 = arith.constant 0 : index
      %36 = vector.load %arg4[%c0_10, %c0_11, %c0_12] : memref<1x8x256xf32, #tpu.memory_space<vmem>>, vector<1x8x256xf32>
      %37 = vector.shape_cast %25 : vector<8x256xf32> to vector<1x8x256xf32>
      %38 = arith.addf %36, %37 : vector<1x8x256xf32>
      %c0_13 = arith.constant 0 : index
      %c0_14 = arith.constant 0 : index
      %c0_15 = arith.constant 0 : index
      %39 = vector.load %arg4[%c0_13, %c0_14, %c0_15] : memref<1x8x256xf32, #tpu.memory_space<vmem>>, vector<1x8x256xf32>
      tpu.vector_store %arg4[%c0_13, %c0_14, %c0_15], %38 {strides = array<i32>} : memref<1x8x256xf32, #tpu.memory_space<vmem>>, vector<1x8x256xf32>,
    } else {
    }
    %34 = arith.extui %30 : i1 to i32
    %c0_i32_9 = arith.constant 0 : i32
    %35 = arith.cmpi ne, %34, %c0_i32_9 : i32
    scf.if %35 {
      %36 = tpu.iota {dimensions = array<i32: 1>} : vector<8x256xi32>
      %37 = vector.broadcast %28 : i32 to vector<8x256xi32>
      %38 = arith.addi %37, %36 : vector<8x256xi32>
      %c0_10 = arith.constant 0 : index
      %c0_11 = arith.constant 0 : index
      %c0_12 = arith.constant 0 : index
      %39 = vector.load %arg4[%c0_10, %c0_11, %c0_12] : memref<1x8x256xf32, #tpu.memory_space<vmem>>, vector<1x8x256xf32>
      %c200_i32_13 = arith.constant 200 : i32
      %40 = vector.broadcast %c200_i32_13 : i32 to vector<8x256xi32>
      %41 = arith.cmpi slt, %38, %40 : vector<8x256xi32>
      %cst_14 = arith.constant 0.000000e+00 : f32
      %42 = vector.broadcast %cst_14 : f32 to vector<8x256xf32>
      %43 = arith.select %41, %25, %42 : vector<8x256xi1>, vector<8x256xf32>
      %44 = vector.shape_cast %43 : vector<8x256xf32> to vector<1x8x256xf32>
      %45 = arith.addf %39, %44 : vector<1x8x256xf32>
      %c0_15 = arith.constant 0 : index
      %c0_16 = arith.constant 0 : index
      %c0_17 = arith.constant 0 : index
      %46 = vector.load %arg4[%c0_15, %c0_16, %c0_17] : memref<1x8x256xf32, #tpu.memory_space<vmem>>, vector<1x8x256xf32>
      tpu.vector_store %arg4[%c0_15, %c0_16, %c0_17], %45 {strides = array<i32>} : memref<1x8x256xf32, #tpu.memory_space<vmem>>, vector<1x8x256xf32>,
    } else {
    }
    return
  }
  func.func @transform_0(%arg0: i32, %arg1: i32) -> (i32, i32, i32) {
    %c1_i32 = arith.constant 1 : i32
    %0 = arith.muli %arg0, %c1_i32 : i32
    %1 = arith.addi %0, %arg1 : i32
    %c0_i32 = arith.constant 0 : i32
    %c0_i32_0 = arith.constant 0 : i32
    %c0_i32_1 = arith.constant 0 : i32
    return %c0_i32, %c0_i32_0, %1 : i32, i32, i32
  }
  func.func @transform_1(%arg0: i32, %arg1: i32) -> (i32, i32) {
    %c1_i32 = arith.constant 1 : i32
    %0 = arith.muli %arg0, %c1_i32 : i32
    %1 = arith.addi %0, %arg1 : i32
    %c0_i32 = arith.constant 0 : i32
    %c0_i32_0 = arith.constant 0 : i32
    return %c0_i32, %1 : i32, i32
  }
  func.func @transform_2(%arg0: i32, %arg1: i32) -> (i32, i32, i32) {
    %c0_i32 = arith.constant 0 : i32
    %c0_i32_0 = arith.constant 0 : i32
    %c0_i32_1 = arith.constant 0 : i32
    return %arg0, %c0_i32, %c0_i32_0 : i32, i32, i32
  }
}

</mosaic_0001>

<bundles_post_ra>
// kernel: tpu_custom_call.1
= control target key start
LH: loop header
LB: loop body
LE: loop exit
PB: predicated region body
PF: predicated region fallthrough
CT: control target
= control target key end

     0   :  { %7 = vsyncpa [#allocation3], 0  ;;  %s1813_s0 = inlined_call_operand.hbm [shape: f32[50,8,256], index: 0, kind: input, shape index: {}]   ;;  %s1814_s1 = inlined_call_operand.hbm [shape: f32[50,256], index: 1, kind: input, shape index: {}]   ;;  %s1815_s2 = inlined_call_operand.hbm [shape: f32[1,8,256], index: 2, kind: output, shape index: {}]  }
   0x1   :  { %8 = vsyncpa [#allocation6], 0 }
   0x2   :  { %9 = vsyncpa [#allocation4], 0  ;;  %s1413_s9 = smov [#allocation2]   ;;  %s1341_s13 = scalar_lea.hbm %s1813_s0, 12800 }
   0x3   :  { %s19_s10 = sshll.u32 %s1413_s9, 4  ;;  %p1342_p0 = scmp.ne.s32.totalorder %s1813_s0, %s1341_s13  ;;  %s20_s10 = int_to_ptr.vmem [resolvable:$true] %s19_s10 }
   0x4   :  { %p1345_p1 = scmp.lt.u32.totalorder %s1341_s13, %s1813_s0 }
   0x6   :  { %p1347_p2 = pnand %p1345_p1, %p1342_p0 }
   0x8   :  { %1350 = shalt.err (!%p1347_p2)
}
   0x9   :  { %s1351_s18 = scalar_lea.vmem %s20_s10, 12800  ;;  %p1356_p4 = scmp.lt.s32.totalorder %s20_s10, %s20_s10 }
   0xa   :  { %p1352_p3 = scmp.ne.s32.totalorder %s20_s10, %s1351_s18  ;;  %p1357_p5 = scmp.lt.s32.totalorder %s1351_s18, %s1351_s18 }
   0xc   :  { %p1358_p6 = por %p1357_p5, %p1356_p4 }
   0xe   :  { %p1359_p7 = pnand %p1358_p6, %p1352_p3 }
  0x10   :  { %1362 = shalt.err (!%p1359_p7)
}
  0x11   :  { %s1414_s19 = smov 256   ;;  %s1415_s20 = smov 16  }
  0x12   :  { %25 = dma.hbm_to_vmem [thread:$0]  %s1813_s0, 12800, %s20_s10, [#allocation3], %s1414_s19, %s1414_s19, %s1415_s20  }
  0x13   :  { %s1416_s23 = smov [#allocation5]   ;;  %s1363_s27 = scalar_lea.hbm %s1814_s1, 1792 }
  0x14   :  { %s35_s24 = sshll.u32 %s1416_s23, 4  ;;  %p1364_p8 = scmp.ne.s32.totalorder %s1814_s1, %s1363_s27  ;;  %s36_s24 = int_to_ptr.vmem [resolvable:$true] %s35_s24 }
  0x15   :  { %p1367_p9 = scmp.lt.u32.totalorder %s1363_s27, %s1814_s1 }
  0x17   :  { %p1369_p10 = pnand %p1367_p9, %p1364_p8 }
  0x19   :  { %1372 = shalt.err (!%p1369_p10)
}
  0x1a   :  { %s1373_s4 = scalar_lea.vmem %s36_s24, 1792  ;;  %p1378_p12 = scmp.lt.s32.totalorder %s36_s24, %s36_s24 }
  0x1b   :  { %p1374_p11 = scmp.ne.s32.totalorder %s36_s24, %s1373_s4  ;;  %p1379_p13 = scmp.lt.s32.totalorder %s1373_s4, %s1373_s4 }
  0x1d   :  { %p1380_p0 = por %p1379_p13, %p1378_p12 }
  0x1f   :  { %p1381_p1 = pnand %p1380_p0, %p1374_p11 }
  0x21   :  { %1384 = shalt.err (!%p1381_p1)
}
  0x22   :  { %41 = dma.hbm_to_vmem [thread:$0]  %s1814_s1, 1792, %s36_s24, [#allocation6], %s1414_s19, %s1414_s19, %s1415_s20  }
  0x23   :  { %1407 = dma.done.wait [#allocation3], 12800  }
  0x24   :  { %1408 = vsyncadd [#allocation3], 4294954496 }
  0x25   :  { %1409 = dma.done.wait [#allocation6], 1792  }
  0x26   :  { %1410 = vsyncadd [#allocation6], 4294965504  ;;  %v1417_v0 = vmov 1966171168   ;;  %v1816_v2 = vlaneseq  ;;  %v1322_v5 = vld [vmem:[#allocation5 + $0x40] ss:$8 sps:$4 sm:$0xff]  }
  0x27   :  { %v189_v1 = vunpack.c.l.s4 %v1417_v0  ;;  %v1324_v6 = vld [vmem:[#allocation5 + $0x44] ss:$8 sps:$4 sm:$0xff]   ;;  %v1325_v8 = vld [vmem:[#allocation5 + $0x50] ss:$8 sps:$4 sm:$0xff]   ;;  %v1327_v9 = vld [vmem:[#allocation5 + $0x54] ss:$8 sps:$4 sm:$0xff]  }
  0x28   :  { %v1459_v4 = vshrl.u32 %v1816_v2, 7  ;;  %v1328_v11 = vld [vmem:[#allocation5 + $0x60] ss:$8 sps:$4 sm:$0x33]   ;;  %v64_v56 = vld [vmem:[#allocation2 + $0x30] sm:$0xff]  ;;  %s1418_s1 = smov [#allocation7]  }
  0x29   :  { %v190_v3 = vunpack.c.0.s8 %v189_v1  ;;  %v62_v0 = vld [vmem:[#allocation2 + $0x20] sm:$0xff]  ;;  %v63_v63 = vld [vmem:[#allocation2 + $0x28] sm:$0xff]  ;;  %v1315_v50 = vld [vmem:[#allocation5 + $0x14] ss:$8 sps:$4 sm:$0xff]   ;;  %s1293_s6 = sshll.u32 %s1418_s1, 4  ;;  %s1294_s6 = int_to_ptr.vmem [resolvable:$true] %s1293_s6 }
  0x2a   :  { %v1476_v23 = vsub.s32 0, %v1459_v4  ;;  %v1479_v24 = vsub.s32 1, %v1459_v4  ;;  %v67_v51 = vld [vmem:[#allocation2 + $0x48] sm:$0xff]  ;;  %v70_v47 = vld [vmem:[#allocation2 + $0x60] sm:$0xff]  ;;  %vm1243_vm0 = vcmp.lt.s32.totalorder %v1459_v4, 3  ;;  %s1385_s7 = scalar_lea.vmem %s1294_s6, 256  ;;  %p1390_p3 = scmp.lt.s32.totalorder %s1294_s6, %s1294_s6 }
  0x2b   :  { %v1462_v7 = vsub.s32 %v190_v3, %v1459_v4  ;;  %v60_v3 = vld [vmem:[#allocation2 + $0x10] sm:$0xff]  ;;  %v71_v46 = vld [vmem:[#allocation2 + $0x68] sm:$0xff]  ;;  %p1386_p2 = scmp.ne.s32.totalorder %s1294_s6, %s1385_s7  ;;  %p1391_p4 = scmp.lt.s32.totalorder %s1385_s7, %s1385_s7 }
  0x2d   :  { %v394_v10 = vrot.slane %v1322_v5, %v1462_v7  ;;  %v401_v12 = vrot.slane %v1324_v6, %v1462_v7  ;;  %v444_v13 = vrot.slane %v1325_v8, %v1462_v7  ;;  %v451_v14 = vrot.slane %v1327_v9, %v1462_v7  ;;  %v1313_v9 = vld [vmem:[#allocation5 + $0x10] ss:$8 sps:$4 sm:$0xff]   ;;  %v58_v8 = vld [vmem:[#allocation2] sm:$0xff]  ;;  %v59_v5 = vld [vmem:[#allocation2 + $0x8] sm:$0xff]  ;;  %p1392_p5 = por %p1391_p4, %p1390_p3 }
  0x2e   :  { %v493_v16 = vrot.slane %v1328_v11, %v1462_v7  ;;  %v244_v61 = vrot.slane %v1313_v9, %v1462_v7 }
  0x2f   :  { %v402_v15 = vcombine.high %v394_v10, %v394_v10  ;;  %v403_v17 = vcombine.high %v401_v12, %v401_v12  ;;  %v452_v18 = vcombine.high %v444_v13, %v444_v13  ;;  %v453_v19 = vcombine.high %v451_v14, %v451_v14  ;;  %p1393_p6 = pnand %p1392_p5, %p1386_p2 }
  0x30   :  { %v1470_v20 = vrot.slane %v394_v10, %v1462_v7  ;;  %v494_v22 = vcombine.high %v493_v16, %v493_v16  ;;  %v1482_v25 = vrot.slane %v401_v12, %v1462_v7  ;;  %v1492_v28 = vrot.slane %v444_v13, %v1462_v7 }
  0x31   :  { %v1473_v21 = vrot.slane %v402_v15, %v1462_v7  ;;  %v1485_v26 = vrot.slane %v403_v17, %v1462_v7  ;;  %v1499_v30 = vrot.slane %v451_v14, %v1462_v7  ;;  %v1502_v31 = vrot.slane %v452_v18, %v1462_v7  ;;  %v1310_v14 = vld [vmem:[#allocation5] ss:$8 sps:$4 sm:$0xff]  }
  0x32   :  { %v1489_v27 = vcombine.high %v1470_v20, %v1470_v20  ;;  %v1505_v32 = vrot.slane %v453_v19, %v1462_v7  ;;  %v1509_v33 = vcombine.high %v1482_v25, %v1482_v25  ;;  %v1517_v35 = vcombine.high %v1492_v28, %v1492_v28 }
  0x33   :  { %v1496_v29 = vcombine.high %v1473_v21, %v1473_v21  ;;  %v1513_v34 = vcombine.high %v1485_v26, %v1485_v26  ;;  %v1520_v36 = vrot.slane %v493_v16, %v1462_v7  ;;  %v1524_v37 = vcombine.high %v1499_v30, %v1499_v30  ;;  %v1312_v16 = vld [vmem:[#allocation5 + $0x4] ss:$8 sps:$4 sm:$0xff]  }
  0x34   :  { %v1528_v38 = vcombine.high %v1502_v31, %v1502_v31  ;;  %v1532_v39 = vcombine.high %v1505_v32, %v1505_v32  ;;  %v1535_v40 = vrot.slane %v494_v22, %v1462_v7  ;;  %v776_v41 = vrot.slane %v1473_v21, %v1476_v23 }
  0x35   :  { %v780_v42 = vrot.slane %v1473_v21, %v1479_v24  ;;  %v784_v43 = vrot.slane %v1489_v27, %v1476_v23  ;;  %v788_v44 = vrot.slane %v1489_v27, %v1479_v24  ;;  %v792_v45 = vrot.slane %v1496_v29, %v1476_v23 }
  0x36   :  { %v194_v15 = vrot.slane %v1310_v14, %v1462_v7  ;;  %v201_v19 = vrot.slane %v1312_v16, %v1462_v7  ;;  %v252_v49 = vcombine.high %v244_v61, %v244_v61  ;;  %v1818_v27 = vrot.slane %v1482_v25, %v1476_v23 }
  0x38   :  { %v202_v17 = vcombine.high %v194_v15, %v194_v15  ;;  %v210_v18 = vrot.slane %v194_v15, %v1462_v7  ;;  %v203_v10 = vcombine.high %v201_v19, %v201_v19  ;;  %v61_v15 = vld [vmem:[#allocation2 + $0x18] sm:$0xff]  ;;  %v217_v16 = vrot.slane %v201_v19, %v1462_v7 }
  0x39   :  { %v65_v19 = vld [vmem:[#allocation2 + $0x38] sm:$0xff] }
  0x3a   :  { %v224_v22 = vrot.slane %v202_v17, %v1462_v7  ;;  %v232_v2 = vcombine.high %v210_v18, %v210_v18  ;;  %v512_v12 = vrot.slane %v210_v18, %v1476_v23  ;;  %v516_v13 = vrot.slane %v210_v18, %v1479_v24 }
  0x3b   :  { %v231_v62 = vrot.slane %v203_v10, %v1462_v7  ;;  %v233_v55 = vcombine.high %v217_v16, %v217_v16  ;;  %v544_v54 = vrot.slane %v217_v16, %v1476_v23  ;;  %v66_v10 = vld [vmem:[#allocation2 + $0x40] sm:$0xff] }
  0x3c   :  { %v234_v11 = vcombine.high %v224_v22, %v224_v22  ;;  %v520_v6 = vrot.slane %v224_v22, %v1476_v23  ;;  %v524_v14 = vrot.slane %v224_v22, %v1479_v24  ;;  %v528_v17 = vrot.slane %v232_v2, %v1476_v23 }
  0x3d   :  { %v532_v1 = vrot.slane %v232_v2, %v1479_v24  ;;  %v1009_v22 = vmul.f32 %v512_v12, %v58_v8  ;;  %v1010_v59 = vmul.f32 %v516_v13, %v59_v5  ;;  %v548_v2 = vrot.slane %v217_v16, %v1479_v24  ;;  %v68_v13 = vld [vmem:[#allocation2 + $0x50] sm:$0xff] }
  0x3e   :  { %v536_v18 = vrot.slane %v234_v11, %v1476_v23  ;;  %v540_v60 = vrot.slane %v234_v11, %v1479_v24  ;;  %v1011_v58 = vmul.f32 %v520_v6, %v60_v3  ;;  %v1012_v57 = vmul.f32 %v524_v14, %v61_v15  ;;  %v69_v14 = vld [vmem:[#allocation2 + $0x58] sm:$0xff] }
  0x3f   :  { %v1013_v53 = vmul.f32 %v528_v17, %v62_v0  ;;  %v1014_v52 = vmul.f32 %v532_v1, %v63_v63  ;;  %v235_v9 = vcombine.high %v231_v62, %v231_v62  ;;  %v552_v11 = vrot.slane %v231_v62, %v1476_v23 }
  0x40   :  { %v556_v5 = vrot.slane %v231_v62, %v1479_v24  ;;  %v1015_v3 = vmul.f32 %v536_v18, %v64_v56  ;;  %v1016_v6 = vmul.f32 %v540_v60, %v65_v19  ;;  %v1109_v8 = vadd.f32 %v1011_v58, %v1009_v22  ;;  %v72_v22 = vld [vmem:[#allocation2 + $0x70] sm:$0xff] }
  0x41   :  { %v1158_v12 = vadd.f32 %v1012_v57, %v1010_v59  ;;  %v260_v15 = vrot.slane %v244_v61, %v1462_v7  ;;  %v560_v0 = vrot.slane %v233_v55, %v1476_v23  ;;  %v564_v63 = vrot.slane %v233_v55, %v1479_v24  ;;  %v73_v55 = vld [vmem:[#allocation2 + $0x78] sm:$0xff] }
  0x42   :  { %v1017_v1 = vmul.f32 %v544_v54, %v66_v10  ;;  %v1018_v16 = vmul.f32 %v548_v2, %v67_v51  ;;  %v1110_v17 = vadd.f32 %v1109_v8, %v1013_v53  ;;  %v251_v62 = vrot.slane %v1315_v50, %v1462_v7  ;;  %v75_v10 = vld [vmem:[#allocation2 + $0x88] sm:$0xff] }
  0x43   :  { %v1159_v48 = vadd.f32 %v1158_v12, %v1014_v52  ;;  %v274_v56 = vrot.slane %v252_v49, %v1462_v7  ;;  %v568_v57 = vrot.slane %v235_v9, %v1476_v23  ;;  %v572_v58 = vrot.slane %v235_v9, %v1479_v24  ;;  %v74_v49 = vld [vmem:[#allocation2 + $0x80] sm:$0xff] }
  0x44   :  { %v1019_v59 = vmul.f32 %v552_v11, %v68_v13  ;;  %v1020_v60 = vmul.f32 %v556_v5, %v69_v14  ;;  %v1111_v61 = vadd.f32 %v1110_v17, %v1015_v3  ;;  %v282_v54 = vcombine.high %v260_v15, %v260_v15  ;;  %v1316_v9 = vld [vmem:[#allocation5 + $0x20] ss:$8 sps:$4 sm:$0xff]   ;;  %v76_v14 = vld [vmem:[#allocation2 + $0x90] sm:$0xff]  ;;  %v77_v17 = vld [vmem:[#allocation2 + $0x98] sm:$0xff] }
  0x45   :  { %v1160_v18 = vadd.f32 %v1159_v48, %v1016_v6  ;;  %v576_v51 = vrot.slane %v260_v15, %v1476_v23  ;;  %v580_v52 = vrot.slane %v260_v15, %v1479_v24  ;;  %v1021_v53 = vmul.f32 %v560_v0, %v70_v47 }
  0x46   :  { %v1022_v19 = vmul.f32 %v564_v63, %v71_v46  ;;  %v1112_v50 = vadd.f32 %v1111_v61, %v1017_v1  ;;  %v253_v8 = vcombine.high %v251_v62, %v251_v62  ;;  %v284_v12 = vcombine.high %v274_v56, %v274_v56  ;;  %v78_v61 = vld [vmem:[#allocation2 + $0xa0] sm:$0xff] }
  0x47   :  { %v1161_v2 = vadd.f32 %v1160_v18, %v1018_v16  ;;  %v584_v11 = vrot.slane %v274_v56, %v1476_v23  ;;  %v588_v48 = vrot.slane %v274_v56, %v1479_v24  ;;  %v1023_v5 = vmul.f32 %v568_v57, %v72_v22  ;;  %v79_v18 = vld [vmem:[#allocation2 + $0xa8] sm:$0xff] }
  0x48   :  { %v1024_v3 = vmul.f32 %v572_v58, %v73_v55  ;;  %v1113_v6 = vadd.f32 %v1112_v50, %v1019_v59  ;;  %v267_v47 = vrot.slane %v251_v62, %v1462_v7  ;;  %v592_v46 = vrot.slane %v282_v54, %v1476_v23  ;;  %v80_v50 = vld [vmem:[#allocation2 + $0xb0] sm:$0xff] }
  0x49   :  { %v1162_v13 = vadd.f32 %v1161_v2, %v1020_v60  ;;  %v596_v15 = vrot.slane %v282_v54, %v1479_v24  ;;  %v1025_v0 = vmul.f32 %v576_v51, %v74_v49  ;;  %v1026_v63 = vmul.f32 %v580_v52, %v75_v10  ;;  %v81_v54 = vld [vmem:[#allocation2 + $0xb8] sm:$0xff] }
  0x4a   :  { %v1114_v1 = vadd.f32 %v1113_v6, %v1021_v53  ;;  %v281_v56 = vrot.slane %v253_v8, %v1462_v7  ;;  %v294_v57 = vrot.slane %v1316_v9, %v1462_v7  ;;  %v600_v58 = vrot.slane %v284_v12, %v1476_v23  ;;  %v82_v8 = vld [vmem:[#allocation2 + $0xc0] sm:$0xff]  ;;  %v83_v9 = vld [vmem:[#allocation2 + $0xc8] sm:$0xff] }
  0x4b   :  { %v1163_v16 = vadd.f32 %v1162_v13, %v1022_v19  ;;  %v604_v59 = vrot.slane %v284_v12, %v1479_v24  ;;  %v1027_v60 = vmul.f32 %v584_v11, %v76_v14  ;;  %v1028_v62 = vmul.f32 %v588_v48, %v77_v17  ;;  %v1318_v13 = vld [vmem:[#allocation5 + $0x24] ss:$8 sps:$4 sm:$0xff]  }
  0x4c   :  { %v1115_v22 = vadd.f32 %v1114_v1, %v1023_v5  ;;  %v283_v51 = vcombine.high %v267_v47, %v267_v47  ;;  %v608_v52 = vrot.slane %v267_v47, %v1476_v23  ;;  %v612_v53 = vrot.slane %v267_v47, %v1479_v24  ;;  %v84_v1 = vld [vmem:[#allocation2 + $0xd0] sm:$0xff] }
  0x4d   :  { %v1164_v55 = vadd.f32 %v1163_v16, %v1024_v3  ;;  %v1029_v19 = vmul.f32 %v592_v46, %v78_v61  ;;  %v1030_v2 = vmul.f32 %v596_v15, %v79_v18  ;;  %v285_v6 = vcombine.high %v281_v56, %v281_v56  ;;  %v85_v16 = vld [vmem:[#allocation2 + $0xd8] sm:$0xff] }
  0x4e   :  { %v1116_v49 = vadd.f32 %v1115_v22, %v1025_v0  ;;  %v302_v12 = vcombine.high %v294_v57, %v294_v57  ;;  %v616_v11 = vrot.slane %v281_v56, %v1476_v23  ;;  %v620_v48 = vrot.slane %v281_v56, %v1479_v24  ;;  %v86_v22 = vld [vmem:[#allocation2 + $0xe0] sm:$0xff] }
  0x4f   :  { %v1165_v10 = vadd.f32 %v1164_v55, %v1026_v63  ;;  %v1031_v5 = vmul.f32 %v600_v58, %v80_v50  ;;  %v1032_v3 = vmul.f32 %v604_v59, %v81_v54  ;;  %v310_v47 = vrot.slane %v294_v57, %v1462_v7  ;;  %v87_v55 = vld [vmem:[#allocation2 + $0xe8] sm:$0xff] }
  0x50   :  { %v1117_v14 = vadd.f32 %v1116_v49, %v1027_v60  ;;  %v624_v46 = vrot.slane %v283_v51, %v1476_v23  ;;  %v628_v15 = vrot.slane %v283_v51, %v1479_v24  ;;  %v1033_v0 = vmul.f32 %v608_v52, %v82_v8  ;;  %v88_v49 = vld [vmem:[#allocation2 + $0xf0] sm:$0xff]  ;;  %v89_v51 = vld [vmem:[#allocation2 + $0xf8] sm:$0xff] }
  0x51   :  { %v1166_v17 = vadd.f32 %v1165_v10, %v1028_v62  ;;  %v1034_v63 = vmul.f32 %v612_v53, %v83_v9  ;;  %v301_v56 = vrot.slane %v1318_v13, %v1462_v7  ;;  %v324_v58 = vrot.slane %v302_v12, %v1462_v7  ;;  %v90_v13 = vld [vmem:[#allocation2 + $0x100] sm:$0xff]  ;;  %v91_v12 = vld [vmem:[#allocation2 + $0x108] sm:$0xff] }
  0x52   :  { %v1118_v61 = vadd.f32 %v1117_v14, %v1029_v19  ;;  %v632_v59 = vrot.slane %v285_v6, %v1476_v23  ;;  %v636_v60 = vrot.slane %v285_v6, %v1479_v24  ;;  %v1035_v62 = vmul.f32 %v616_v11, %v84_v1  ;;  %v1319_v6 = vld [vmem:[#allocation5 + $0x30] ss:$8 sps:$4 sm:$0xff]  }
  0x53   :  { %v1167_v18 = vadd.f32 %v1166_v17, %v1030_v2  ;;  %v1036_v57 = vmul.f32 %v620_v48, %v85_v16  ;;  %v332_v52 = vcombine.high %v310_v47, %v310_v47  ;;  %v640_v53 = vrot.slane %v310_v47, %v1476_v23 }
  0x54   :  { %v1119_v50 = vadd.f32 %v1118_v61, %v1031_v5  ;;  %v644_v19 = vrot.slane %v310_v47, %v1479_v24  ;;  %v1037_v2 = vmul.f32 %v624_v46, %v86_v22  ;;  %v1038_v10 = vmul.f32 %v628_v15, %v87_v55  ;;  %v92_v61 = vld [vmem:[#allocation2 + $0x110] sm:$0xff] }
  0x55   :  { %v1168_v54 = vadd.f32 %v1167_v18, %v1032_v3  ;;  %v303_v14 = vcombine.high %v301_v56, %v301_v56  ;;  %v334_v17 = vcombine.high %v324_v58, %v324_v58  ;;  %v648_v11 = vrot.slane %v324_v58, %v1476_v23  ;;  %v93_v18 = vld [vmem:[#allocation2 + $0x118] sm:$0xff] }
  0x56   :  { %v1120_v8 = vadd.f32 %v1119_v50, %v1033_v0  ;;  %v652_v48 = vrot.slane %v324_v58, %v1479_v24  ;;  %v1039_v5 = vmul.f32 %v632_v59, %v88_v49  ;;  %v1040_v3 = vmul.f32 %v636_v60, %v89_v51  ;;  %v94_v50 = vld [vmem:[#allocation2 + $0x120] sm:$0xff] }
  0x57   :  { %v1169_v9 = vadd.f32 %v1168_v54, %v1034_v63  ;;  %v317_v47 = vrot.slane %v301_v56, %v1462_v7  ;;  %v656_v46 = vrot.slane %v332_v52, %v1476_v23  ;;  %v660_v15 = vrot.slane %v332_v52, %v1479_v24  ;;  %v95_v54 = vld [vmem:[#allocation2 + $0x128] sm:$0xff]  ;;  %v97_v52 = vld [vmem:[#allocation2 + $0x138] sm:$0xff] }
  0x58   :  { %v1121_v1 = vadd.f32 %v1120_v8, %v1035_v62  ;;  %v1041_v0 = vmul.f32 %v640_v53, %v90_v13  ;;  %v1042_v63 = vmul.f32 %v644_v19, %v91_v12  ;;  %v331_v58 = vrot.slane %v303_v14, %v1462_v7  ;;  %v96_v8 = vld [vmem:[#allocation2 + $0x130] sm:$0xff]  ;;  %v98_v14 = vld [vmem:[#allocation2 + $0x140] sm:$0xff] }
  0x59   :  { %v1170_v16 = vadd.f32 %v1169_v9, %v1036_v57  ;;  %v344_v59 = vrot.slane %v1319_v6, %v1462_v7  ;;  %v664_v60 = vrot.slane %v334_v17, %v1476_v23  ;;  %v668_v62 = vrot.slane %v334_v17, %v1479_v24  ;;  %v99_v6 = vld [vmem:[#allocation2 + $0x148] sm:$0xff] }
  0x5a   :  { %v1122_v22 = vadd.f32 %v1121_v1, %v1037_v2  ;;  %v1043_v57 = vmul.f32 %v648_v11, %v92_v61  ;;  %v1044_v56 = vmul.f32 %v652_v48, %v93_v18  ;;  %v333_v53 = vcombine.high %v317_v47, %v317_v47 }
  0x5b   :  { %v1171_v55 = vadd.f32 %v1170_v16, %v1038_v10  ;;  %v672_v19 = vrot.slane %v317_v47, %v1476_v23  ;;  %v676_v2 = vrot.slane %v317_v47, %v1479_v24  ;;  %v1045_v10 = vmul.f32 %v656_v46, %v94_v50  ;;  %v1321_v16 = vld [vmem:[#allocation5 + $0x34] ss:$8 sps:$4 sm:$0xff]  }
  0x5c   :  { %v1123_v49 = vadd.f32 %v1122_v22, %v1039_v5  ;;  %v1046_v9 = vmul.f32 %v660_v15, %v95_v54  ;;  %v335_v1 = vcombine.high %v331_v58, %v331_v58  ;;  %v352_v17 = vcombine.high %v344_v59, %v344_v59  ;;  %v100_v22 = vld [vmem:[#allocation2 + $0x150] sm:$0xff] }
  0x5d   :  { %v1172_v51 = vadd.f32 %v1171_v55, %v1040_v3  ;;  %v680_v11 = vrot.slane %v331_v58, %v1476_v23  ;;  %v684_v48 = vrot.slane %v331_v58, %v1479_v24  ;;  %v1047_v5 = vmul.f32 %v664_v60, %v96_v8  ;;  %v101_v55 = vld [vmem:[#allocation2 + $0x158] sm:$0xff] }
  0x5e   :  { %v1124_v13 = vadd.f32 %v1123_v49, %v1041_v0  ;;  %v1048_v3 = vmul.f32 %v668_v62, %v97_v52  ;;  %v360_v47 = vrot.slane %v344_v59, %v1462_v7  ;;  %v688_v46 = vrot.slane %v333_v53, %v1476_v23  ;;  %v102_v49 = vld [vmem:[#allocation2 + $0x160] sm:$0xff] }
  0x5f   :  { %v1173_v12 = vadd.f32 %v1172_v51, %v1042_v63  ;;  %v692_v15 = vrot.slane %v333_v53, %v1479_v24  ;;  %v1049_v0 = vmul.f32 %v672_v19, %v98_v14  ;;  %v1050_v63 = vmul.f32 %v676_v2, %v99_v6  ;;  %v103_v51 = vld [vmem:[#allocation2 + $0x168] sm:$0xff]  ;;  %v105_v53 = vld [vmem:[#allocation2 + $0x178] sm:$0xff] }
  0x60   :  { %v1125_v61 = vadd.f32 %v1124_v13, %v1043_v57  ;;  %v351_v58 = vrot.slane %v1321_v16, %v1462_v7  ;;  %v374_v60 = vrot.slane %v352_v17, %v1462_v7  ;;  %v696_v62 = vrot.slane %v335_v1, %v1476_v23  ;;  %v104_v13 = vld [vmem:[#allocation2 + $0x170] sm:$0xff]  ;;  %v106_v16 = vld [vmem:[#allocation2 + $0x180] sm:$0xff]  ;;  %v107_v17 = vld [vmem:[#allocation2 + $0x188] sm:$0xff] }
  0x61   :  { %v1174_v18 = vadd.f32 %v1173_v12, %v1044_v56  ;;  %v700_v57 = vrot.slane %v335_v1, %v1479_v24  ;;  %v1051_v56 = vmul.f32 %v680_v11, %v100_v22  ;;  %v1052_v59 = vmul.f32 %v684_v48, %v101_v55  ;;  %v108_v55 = vld [vmem:[#allocation2 + $0x190] sm:$0xff] }
  0x62   :  { %v1126_v50 = vadd.f32 %v1125_v61, %v1045_v10  ;;  %v382_v19 = vcombine.high %v360_v47, %v360_v47  ;;  %v704_v2 = vrot.slane %v360_v47, %v1476_v23  ;;  %v708_v10 = vrot.slane %v360_v47, %v1479_v24 }
  0x63   :  { %v1175_v54 = vadd.f32 %v1174_v18, %v1046_v9  ;;  %v1053_v9 = vmul.f32 %v688_v46, %v102_v49  ;;  %v1054_v12 = vmul.f32 %v692_v15, %v103_v51  ;;  %v353_v61 = vcombine.high %v351_v58, %v351_v58  ;;  %v110_v51 = vld [vmem:[#allocation2 + $0x1a0] sm:$0xff] }
  0x64   :  { %v1127_v8 = vadd.f32 %v1126_v50, %v1047_v5  ;;  %v384_v18 = vcombine.high %v374_v60, %v374_v60  ;;  %v712_v1 = vrot.slane %v374_v60, %v1476_v23  ;;  %v716_v11 = vrot.slane %v374_v60, %v1479_v24  ;;  %v109_v50 = vld [vmem:[#allocation2 + $0x198] sm:$0xff] }
  0x65   :  { %v1176_v52 = vadd.f32 %v1175_v54, %v1048_v3  ;;  %v1055_v48 = vmul.f32 %v696_v62, %v104_v13  ;;  %v1056_v5 = vmul.f32 %v700_v57, %v105_v53  ;;  %v367_v47 = vrot.slane %v351_v58, %v1462_v7  ;;  %v112_v13 = vld [vmem:[#allocation2 + $0x1b0] sm:$0xff]  ;;  %v113_v53 = vld [vmem:[#allocation2 + $0x1b8] sm:$0xff] }
  0x66   :  { %v1128_v14 = vadd.f32 %v1127_v8, %v1049_v0  ;;  %v720_v46 = vrot.slane %v382_v19, %v1476_v23  ;;  %v724_v15 = vrot.slane %v382_v19, %v1479_v24  ;;  %v1057_v0 = vmul.f32 %v704_v2, %v106_v16  ;;  %v111_v8 = vld [vmem:[#allocation2 + $0x1a8] sm:$0xff] }
  0x67   :  { %v1177_v6 = vadd.f32 %v1176_v52, %v1050_v63  ;;  %v1058_v63 = vmul.f32 %v708_v10, %v107_v17  ;;  %v381_v60 = vrot.slane %v353_v61, %v1462_v7  ;;  %v728_v62 = vrot.slane %v384_v18, %v1476_v23  ;;  %v114_v7 = vld [vmem:[#allocation2 + $0x1c0] sm:$0xff]  ;;  %v115_v16 = vld [vmem:[#allocation2 + $0x1c8] sm:$0xff] }
  0x68   :  { %v1129_v3 = vadd.f32 %v1128_v14, %v1051_v56  ;;  %v732_v57 = vrot.slane %v384_v18, %v1479_v24  ;;  %v1059_v56 = vmul.f32 %v712_v1, %v108_v55  ;;  %v383_v14 = vcombine.high %v367_v47, %v367_v47 }
  0x69   :  { %v1178_v22 = vadd.f32 %v1177_v6, %v1052_v59  ;;  %v1060_v59 = vmul.f32 %v716_v11, %v109_v50  ;;  %v736_v19 = vrot.slane %v367_v47, %v1476_v23  ;;  %v740_v2 = vrot.slane %v367_v47, %v1479_v24 }
  0x6a   :  { %v1130_v54 = vadd.f32 %v1129_v3, %v1053_v9  ;;  %v1061_v10 = vmul.f32 %v720_v46, %v110_v51  ;;  %v1062_v9 = vmul.f32 %v724_v15, %v111_v8  ;;  %v385_v17 = vcombine.high %v381_v60, %v381_v60  ;;  %v116_v3 = vld [vmem:[#allocation2 + $0x1d0] sm:$0xff] }
  0x6b   :  { %v1179_v49 = vadd.f32 %v1178_v22, %v1054_v12  ;;  %v744_v61 = vrot.slane %v381_v60, %v1476_v23  ;;  %v748_v18 = vrot.slane %v381_v60, %v1479_v24  ;;  %v1063_v1 = vmul.f32 %v728_v62, %v112_v13  ;;  %v117_v22 = vld [vmem:[#allocation2 + $0x1d8] sm:$0xff] }
  0x6c   :  { %v1131_v52 = vadd.f32 %v1130_v54, %v1055_v48  ;;  %v1064_v11 = vmul.f32 %v732_v57, %v113_v53  ;;  %v752_v55 = vrot.slane %v383_v14, %v1476_v23  ;;  %v756_v50 = vrot.slane %v383_v14, %v1479_v24  ;;  %v119_v54 = vld [vmem:[#allocation2 + $0x1e8] sm:$0xff] }
  0x6d   :  { %v1180_v58 = vadd.f32 %v1179_v49, %v1056_v5  ;;  %v1065_v47 = vmul.f32 %v736_v19, %v114_v7  ;;  %v1066_v46 = vmul.f32 %v740_v2, %v115_v16  ;;  %v760_v49 = vrot.slane %v385_v17, %v1476_v23  ;;  %v122_v2 = vld [vmem:[#allocation2 + $0x200] sm:$0xff]  ;;  %v124_v16 = vld [vmem:[#allocation2 + $0x210] sm:$0xff] }
  0x6e   :  { %v1132_v12 = vadd.f32 %v1131_v52, %v1057_v0  ;;  %v764_v51 = vrot.slane %v385_v17, %v1479_v24  ;;  %v1067_v8 = vmul.f32 %v744_v61, %v116_v3  ;;  %v1068_v60 = vmul.f32 %v748_v18, %v117_v22  ;;  %v125_v17 = vld [vmem:[#allocation2 + $0x218] sm:$0xff] }
  0x6f   :  { %v1181_v6 = vadd.f32 %v1180_v58, %v1058_v63  ;;  %v118_v63 = vld [vmem:[#allocation2 + $0x1e0] sm:$0xff]  ;;  %v768_v52 = vrot.slane %v1470_v20, %v1476_v23  ;;  %v772_v58 = vrot.slane %v1470_v20, %v1479_v24  ;;  %v1070_v53 = vmul.f32 %v756_v50, %v119_v54  ;;  %v128_v50 = vld [vmem:[#allocation2 + $0x230] sm:$0xff] }
  0x70   :  { %v1133_v48 = vadd.f32 %v1132_v12, %v1059_v56  ;;  %v120_v56 = vld [vmem:[#allocation2 + $0x1f0] sm:$0xff]  ;;  %v1069_v13 = vmul.f32 %v752_v55, %v118_v63  ;;  %v1075_v20 = vmul.f32 %v776_v41, %v124_v16  ;;  %v1076_v3 = vmul.f32 %v780_v42, %v125_v17  ;;  %v130_v54 = vld [vmem:[#allocation2 + $0x240] sm:$0xff]  ;;  %v131_v41 = vld [vmem:[#allocation2 + $0x248] sm:$0xff] }
  0x71   :  { %v1182_v5 = vadd.f32 %v1181_v6, %v1060_v59  ;;  %v121_v59 = vld [vmem:[#allocation2 + $0x1f8] sm:$0xff]  ;;  %v1073_v61 = vmul.f32 %v768_v52, %v122_v2  ;;  %v1079_v21 = vmul.f32 %v792_v45, %v128_v50  ;;  %v1817_v42 = vrot.slane %v1496_v29, %v1479_v24  ;;  %v134_v52 = vld [vmem:[#allocation2 + $0x260] sm:$0xff]  ;;  %v135_v45 = vld [vmem:[#allocation2 + $0x268] sm:$0xff] }
  0x72   :  { %v1134_v15 = vadd.f32 %v1133_v48, %v1061_v10  ;;  %v123_v10 = vld [vmem:[#allocation2 + $0x208] sm:$0xff]  ;;  %v1072_v12 = vmul.f32 %v764_v51, %v121_v59  ;;  %v126_v48 = vld [vmem:[#allocation2 + $0x220] sm:$0xff]  ;;  %v1820_v29 = vrot.slane %v1485_v26, %v1476_v23  ;;  %v136_v2 = vld [vmem:[#allocation2 + $0x270] sm:$0xff] }
  0x73   :  { %v1183_v0 = vadd.f32 %v1182_v5, %v1062_v9  ;;  %v1071_v9 = vmul.f32 %v760_v49, %v120_v56  ;;  %v1074_v18 = vmul.f32 %v772_v58, %v123_v10  ;;  %v127_v5 = vld [vmem:[#allocation2 + $0x228] sm:$0xff]  ;;  %v137_v10 = vld [vmem:[#allocation2 + $0x278] sm:$0xff]  ;;  %v138_v17 = vld [vmem:[#allocation2 + $0x280] sm:$0xff] }
  0x74   :  { %v1135_v62 = vadd.f32 %v1134_v15, %v1063_v1  ;;  %v1078_v15 = vmul.f32 %v788_v44, %v127_v5  ;;  %v1081_v44 = vmul.f32 %v1818_v27, %v130_v54  ;;  %v1829_v54 = vrot.slane %v1502_v31, %v1479_v24 }
  0x75   :  { %v1184_v57 = vadd.f32 %v1183_v0, %v1064_v11 }
  0x76   :  { %v1136_v14 = vadd.f32 %v1135_v62, %v1065_v47  ;;  %v129_v47 = vld [vmem:[#allocation2 + $0x238] sm:$0xff]  ;;  %v1819_v62 = vrot.slane %v1482_v25, %v1479_v24  ;;  %v1822_v25 = vrot.slane %v1509_v33, %v1476_v23 }
  0x77   :  { %v1185_v19 = vadd.f32 %v1184_v57, %v1066_v46  ;;  %v1077_v46 = vmul.f32 %v784_v43, %v126_v48  ;;  %v1080_v49 = vmul.f32 %v1817_v42, %v129_v47  ;;  %v133_v43 = vld [vmem:[#allocation2 + $0x258] sm:$0xff] }
  0x78   :  { %v1137_v6 = vadd.f32 %v1136_v14, %v1067_v8  ;;  %v1082_v57 = vmul.f32 %v1819_v62, %v131_v41  ;;  %v146_v62 = vld [vmem:[#allocation2 + $0x2c0] sm:$0xff] }
  0x79   :  { %v1186_v7 = vadd.f32 %v1185_v19, %v1068_v60  ;;  %v132_v60 = vld [vmem:[#allocation2 + $0x250] sm:$0xff] }
  0x7a   :  { %v1138_v1 = vadd.f32 %v1137_v6, %v1069_v13  ;;  %v1083_v58 = vmul.f32 %v1820_v29, %v132_v60  ;;  %v1821_v13 = vrot.slane %v1485_v26, %v1479_v24  ;;  %v1824_v26 = vrot.slane %v1513_v34, %v1476_v23 }
  0x7b   :  { %v1187_v11 = vadd.f32 %v1186_v7, %v1070_v53  ;;  %v1831_v60 = vrot.slane %v1517_v35, %v1479_v24 }
  0x7c   :  { %v1139_v22 = vadd.f32 %v1138_v1, %v1071_v9  ;;  %v1084_v53 = vmul.f32 %v1821_v13, %v133_v43  ;;  %v1085_v9 = vmul.f32 %v1822_v25, %v134_v52  ;;  %v1825_v1 = vrot.slane %v1513_v34, %v1479_v24  ;;  %v149_v13 = vld [vmem:[#allocation2 + $0x2d8] sm:$0xff]  ;;  %v150_v25 = vld [vmem:[#allocation2 + $0x2e0] sm:$0xff] }
  0x7d   :  { %v1188_v55 = vadd.f32 %v1187_v11, %v1072_v12  ;;  %v1823_v12 = vrot.slane %v1509_v33, %v1479_v24  ;;  %v1826_v33 = vrot.slane %v1492_v28, %v1476_v23  ;;  %v1828_v34 = vrot.slane %v1502_v31, %v1476_v23 }
  0x7e   :  { %v1140_v0 = vadd.f32 %v1139_v22, %v1073_v61  ;;  %v139_v61 = vld [vmem:[#allocation2 + $0x288] sm:$0xff]  ;;  %v1088_v11 = vmul.f32 %v1825_v1, %v137_v10  ;;  %v1832_v31 = vrot.slane %v1528_v38, %v1476_v23  ;;  %v1839_v1 = vrot.slane %v1524_v37, %v1479_v24 }
  0x7f   :  { %v1189_v63 = vadd.f32 %v1188_v55, %v1074_v18  ;;  %v1086_v6 = vmul.f32 %v1823_v12, %v135_v45  ;;  %v1087_v18 = vmul.f32 %v1824_v26, %v136_v2  ;;  %v1089_v22 = vmul.f32 %v1826_v33, %v138_v17  ;;  %v153_v26 = vld [vmem:[#allocation2 + $0x2f8] sm:$0xff] }
  0x80   :  { %v1141_v51 = vadd.f32 %v1140_v0, %v1075_v20  ;;  %v140_v20 = vld [vmem:[#allocation2 + $0x290] sm:$0xff]  ;;  %v1827_v55 = vrot.slane %v1492_v28, %v1479_v24  ;;  %v143_v0 = vld [vmem:[#allocation2 + $0x2a8] sm:$0xff]  ;;  %v1830_v28 = vrot.slane %v1517_v35, %v1476_v23  ;;  %v1834_v35 = vrot.slane %v1499_v30, %v1476_v23 }
  0x81   :  { %v1190_v8 = vadd.f32 %v1189_v63, %v1076_v3  ;;  %v141_v3 = vld [vmem:[#allocation2 + $0x298] sm:$0xff]  ;;  %v1091_v63 = vmul.f32 %v1828_v34, %v140_v20  ;;  %v1094_v43 = vmul.f32 %v1831_v60, %v143_v0  ;;  %v154_v20 = vld [vmem:[#allocation2 + $0x300] sm:$0xff]  ;;  %v1843_v34 = vrot.slane %v1520_v36, %v1479_v24 }
  0x82   :  { %v1142_v56 = vadd.f32 %v1141_v51, %v1077_v46  ;;  %v1090_v50 = vmul.f32 %v1827_v55, %v139_v61  ;;  %v1092_v41 = vmul.f32 %v1829_v54, %v141_v3  ;;  %v145_v51 = vld [vmem:[#allocation2 + $0x2b8] sm:$0xff]  ;;  %v152_v61 = vld [vmem:[#allocation2 + $0x2f0] sm:$0xff]  ;;  %v155_v3 = vld [vmem:[#allocation2 + $0x308] sm:$0xff] }
  0x83   :  { %v1191_v59 = vadd.f32 %v1190_v8, %v1078_v15  ;;  %v142_v15 = vld [vmem:[#allocation2 + $0x2a0] sm:$0xff] }
  0x84   :  { %v1143_v14 = vadd.f32 %v1142_v56, %v1079_v21  ;;  %v1093_v8 = vmul.f32 %v1830_v28, %v142_v15  ;;  %v157_v15 = vld [vmem:[#allocation2 + $0x318] sm:$0xff] }
  0x85   :  { %v1192_v19 = vadd.f32 %v1191_v59, %v1080_v49  ;;  %v144_v49 = vld [vmem:[#allocation2 + $0x2b0] sm:$0xff]  ;;  %v1833_v59 = vrot.slane %v1528_v38, %v1479_v24  ;;  %v1836_v38 = vrot.slane %v1505_v32, %v1476_v23 }
  0x86   :  { %v1144_v7 = vadd.f32 %v1143_v14, %v1081_v44  ;;  %v1095_v56 = vmul.f32 %v1832_v31, %v144_v49  ;;  %v1835_v14 = vrot.slane %v1499_v30, %v1479_v24  ;;  %v1838_v30 = vrot.slane %v1524_v37, %v1476_v23 }
  0x87   :  { %v1193_v16 = vadd.f32 %v1192_v19, %v1082_v57  ;;  %v147_v57 = vld [vmem:[#allocation2 + $0x2c8] sm:$0xff]  ;;  %v1096_v52 = vmul.f32 %v1833_v59, %v145_v51  ;;  %v1842_v37 = vrot.slane %v1520_v36, %v1476_v23 }
  0x88   :  { %v1145_v48 = vadd.f32 %v1144_v7, %v1083_v58  ;;  %v148_v58 = vld [vmem:[#allocation2 + $0x2d0] sm:$0xff]  ;;  %v1098_v19 = vmul.f32 %v1835_v14, %v147_v57 }
  0x89   :  { %v1194_v5 = vadd.f32 %v1193_v16, %v1084_v53  ;;  %v1097_v53 = vmul.f32 %v1834_v35, %v146_v62  ;;  %v1099_v12 = vmul.f32 %v1836_v38, %v148_v58  ;;  %v1105_v0 = vmul.f32 %v1842_v37, %v154_v20 }
  0x8a   :  { %v1146_v47 = vadd.f32 %v1145_v48, %v1085_v9  ;;  %v151_v9 = vld [vmem:[#allocation2 + $0x2e8] sm:$0xff] }
  0x8b   :  { %v1195_v46 = vadd.f32 %v1194_v5, %v1086_v6  ;;  %v1837_v6 = vrot.slane %v1505_v32, %v1479_v24  ;;  %v1840_v32 = vrot.slane %v1532_v39, %v1476_v23 }
  0x8c   :  { %v1147_v21 = vadd.f32 %v1146_v47, %v1087_v18  ;;  %v1101_v18 = vmul.f32 %v1838_v30, %v150_v25 }
  0x8d   :  { %v1196_v42 = vadd.f32 %v1195_v46, %v1088_v11  ;;  %v1100_v7 = vmul.f32 %v1837_v6, %v149_v13  ;;  %v1102_v11 = vmul.f32 %v1839_v1, %v151_v9  ;;  %v1103_v33 = vmul.f32 %v1840_v32, %v152_v61  ;;  %v156_v46 = vld [vmem:[#allocation2 + $0x310] sm:$0xff] }
  0x8e   :  { %v1148_v27 = vadd.f32 %v1147_v21, %v1089_v22  ;;  %v1841_v22 = vrot.slane %v1532_v39, %v1479_v24  ;;  %v1844_v21 = vrot.slane %v1535_v40, %v1476_v23  ;;  %v1845_v39 = vrot.slane %v1535_v40, %v1479_v24 }
  0x8f   :  { %v1197_v44 = vadd.f32 %v1196_v42, %v1090_v50 }
  0x90   :  { %v1149_v45 = vadd.f32 %v1148_v27, %v1091_v63  ;;  %v1104_v55 = vmul.f32 %v1841_v22, %v153_v26  ;;  %v1106_v63 = vmul.f32 %v1843_v34, %v155_v3  ;;  %v1107_v42 = vmul.f32 %v1844_v21, %v156_v46 }
  0x91   :  { %v1198_v29 = vadd.f32 %v1197_v44, %v1092_v41  ;;  %v1108_v49 = vmul.f32 %v1845_v39, %v157_v15 }
  0x92   :  { %v1150_v2 = vadd.f32 %v1149_v45, %v1093_v8 }
  0x93   :  { %v1199_v10 = vadd.f32 %v1198_v29, %v1094_v43 }
  0x94   :  { %v1151_v16 = vadd.f32 %v1150_v2, %v1095_v56 }
  0x95   :  { %v1200_v17 = vadd.f32 %v1199_v10, %v1096_v52 }
  0x96   :  { %v1152_v48 = vadd.f32 %v1151_v16, %v1097_v53 }
  0x97   :  { %v1201_v5 = vadd.f32 %v1200_v17, %v1098_v19 }
  0x98   :  { %v1153_v50 = vadd.f32 %v1152_v48, %v1099_v12 }
  0x99   :  { %v1202_v47 = vadd.f32 %v1201_v5, %v1100_v7 }
  0x9a   :  { %v1154_v54 = vadd.f32 %v1153_v50, %v1101_v18  ;;  %v1846_v18 = vlaneseq }
  0x9b   :  { %v1203_v41 = vadd.f32 %v1202_v47, %v1102_v11 }
  0x9c   :  { %v1155_v51 = vadd.f32 %v1154_v54, %v1103_v33  ;;  %v1272_v1 = vand.u32 127, %v1846_v18 }
  0x9d   :  { %v1204_v28 = vadd.f32 %v1203_v41, %v1104_v55 }
  0x9e   :  { %v1156_v8 = vadd.f32 %v1155_v51, %v1105_v0  ;;  %v1273_v3 = vadd.s32 128, %v1272_v1 }
  0x9f   :  { %v1205_v60 = vadd.f32 %v1204_v28, %v1106_v63 }
  0xa0   :  { %v1157_v43 = vadd.f32 %v1156_v8, %v1107_v42  ;;  %vm1280_vm1 = vcmp.lt.s32.totalorder %v1273_v3, 200 }
  0xa1   :  { %v1206_v27 = vadd.f32 %v1205_v60, %v1108_v49 }
  0xa2   :  { %v1207_v44 = vrot.slane %v1157_v43, 4 }
  0xa3   :  { %v1213_v62 = vrot.slane %v1206_v27, 4 }
  0xa4   :  { %v1208_v36 = vmax.f32 %v1157_v43, %v1207_v44 }
  0xa5   :  { %v1214_v57 = vmax.f32 %v1206_v27, %v1213_v62 }
  0xa6   :  { %v1209_v31 = vrot.slane %v1208_v36, 2 }
  0xa7   :  { %v1215_v56 = vrot.slane %v1214_v57, 2 }
  0xa8   :  { %v1210_v59 = vmax.f32 %v1208_v36, %v1209_v31 }
  0xa9   :  { %v1216_v52 = vmax.f32 %v1214_v57, %v1215_v56 }
  0xaa   :  { %v1211_v23 = vrot.slane %v1210_v59, 1 }
  0xab   :  { %v1217_v45 = vrot.slane %v1216_v52, 1 }
  0xac   :  { %v1212_v29 = vmax.f32 %v1210_v59, %v1211_v23 }
  0xad   :  { %v1218_v58 = vmax.f32 %v1216_v52, %v1217_v45 }
  0xae   :  { %v1219_v24 = vsub.f32 %v1157_v43, %v1212_v29 }
  0xaf   :  { %v1220_v40 = vsub.f32 %v1206_v27, %v1218_v58 }
  0xb0   :  { %v1221_v13 = vmul.f32 1.442695, %v1219_v24 }
  0xb1   :  { %v1223_v35 = vmul.f32 1.442695, %v1220_v40 }
  0xb2   :  { %1329 = vpow2.f32 %v1221_v13 }
  0xb3   :  { %1331 = vpow2.f32 %v1223_v35 }
  0xbc   :  { %v1330_v53 = vpop.eup %1329 }
  0xbd   :  { %v1332_v14 = vpop.eup %1331  ;;  %v1225_v19 = vrot.slane %v1330_v53, 4 }
  0xbe   :  { %v1231_v2 = vrot.slane %v1332_v14, 4 }
  0xbf   :  { %v1226_v10 = vadd.f32 %v1330_v53, %v1225_v19 }
  0xc0   :  { %v1232_v25 = vadd.f32 %v1332_v14, %v1231_v2 }
  0xc1   :  { %v1227_v9 = vrot.slane %v1226_v10, 2 }
  0xc2   :  { %v1233_v38 = vrot.slane %v1232_v25, 2 }
  0xc3   :  { %v1228_v12 = vadd.f32 %v1227_v9, %v1226_v10 }
  0xc4   :  { %v1234_v6 = vadd.f32 %v1233_v38, %v1232_v25 }
  0xc5   :  { %v1229_v7 = vrot.slane %v1228_v12, 1 }
  0xc6   :  { %v1235_v16 = vrot.slane %v1234_v6, 1 }
  0xc7   :  { %v1230_v17 = vadd.f32 %v1229_v7, %v1228_v12 }
  0xc8   :  { %v1236_v61 = vadd.f32 %v1235_v16, %v1234_v6 }
  0xc9   :  { %1333 = vlog2.f32 %v1230_v17  ;;  %v1244_v26 = vsub.f32 %v1230_v17, %v1330_v53 }
  0xca   :  { %1335 = vlog2.f32 %v1236_v61  ;;  %v1245_v30 = vsub.f32 %v1236_v61, %v1332_v14 }
  0xcb   :  { %1337 = vlog2.f32 %v1244_v26 }
  0xcc   :  { %1339 = vlog2.f32 %v1245_v30 }
  0xd3   :  { %v1334_v11 = vpop.eup %1333 }
  0xd4   :  { %v1336_v48 = vpop.eup %1335  ;;  %v1238_v20 = vmul.f32 0.6931472, %v1334_v11 }
  0xd5   :  { %v1338_v5 = vpop.eup %1337  ;;  %v1240_v33 = vmul.f32 0.6931472, %v1336_v48 }
  0xd6   :  { %v1340_v32 = vpop.eup %1339  ;;  %v1247_v22 = vmul.f32 0.6931472, %v1338_v5 }
  0xd7   :  { %v1249_v55 = vmul.f32 0.6931472, %v1340_v32 }
  0xd8   :  { %v1250_v50 = vsel %vm1243_vm0, %v1219_v24, %v1247_v22 }
  0xd9   :  { %v1251_v47 = vsel %vm1243_vm0, %v1220_v40, %v1249_v55  ;;  %v1252_v46 = vsub.f32 %v1250_v50, %v1238_v20 }
  0xda   :  { %v1253_v15 = vsub.f32 %v1251_v47, %v1240_v33 }
  0xdb   :  { %1285 = vst [vmem:[#allocation7] sm:$0xff] %v1252_v46 }
  0xdc   :  { %v1282_v37 = vsel %vm1280_vm1, %v1253_v15, 0.0 }
  0xdd   :  { %1286 = vst [vmem:[#allocation7 + $0x8] sm:$0xff] %v1282_v37 }
  0xde   :  { %1396 = shalt.err (!%p1393_p6)
}
  0xdf   :  { %s1397_s10 = scalar_lea.hbm %s1815_s2, 256 }
  0xe0   :  { %p1398_p7 = scmp.ne.s32.totalorder %s1815_s2, %s1397_s10  ;;  %p1401_p8 = scmp.lt.u32.totalorder %s1397_s10, %s1815_s2 }
  0xe2   :  { %p1403_p9 = pnand %p1401_p8, %p1398_p7 }
  0xe4   :  { %1406 = shalt.err (!%p1403_p9)
}
  0xe5   :  { %1296 = dma.vmem_to_hbm [thread:$0]  %s1294_s6, 256, %s1815_s2, [#allocation4]  }
  0xe6   :  { %1411 = dma.done.wait [#allocation4], 256  }
  0xe7   :  { %1412 = vsyncadd [#allocation4], 4294967040 }
  0xe8   :  { %1300 = vsyncpa [#allocation3], 1 }
  0xe9   :  { %1301 = vsyncpa [#allocation6], 1 }
  0xea   :  { %1302 = vsyncpa [#allocation4], 1 }

</bundles_post_ra>
